<compile_context>
chip_gen: v7x
topology: tpu7x:2x2x1
jax: 0.10.0
libtpu: 0.0.40
codegen_flags: <defaults>
</compile_context>

<pallas_src>
import jax
import jax.numpy as jnp
from jax.experimental import pallas as pl
from jax.experimental.pallas import tpu as pltpu


def _mask_head_kernel(x_ref, ha_ref, hb_ref, w1_ref, b1_ref, w2_ref, b2_ref,
                      o_ref):
    # x_ref : (1, TH*W, 3*Cin) bf16  body rows of the dw-im2col'd padded input
    # ha_ref: (1, W,    3*Cin) bf16  first halo row below the body
    # hb_ref: (1, W,    3*Cin) bf16  second halo row below the body
    # w1_ref: (3, 3*Cin, Cmid) bf16  3x3 weights, dh-major, (dw,Cin) fused
    # b1_ref: (1, Cmid)        f32
    # w2_ref: (Cmid, Cout)     bf16  1x1 weights
    # b2_ref: (1, Cout)        f32
    # o_ref : (1, TH*W, Cout)        lane-dense output slab
    n_out = o_ref.shape[1]        # TH * W
    w_cols = ha_ref.shape[1]      # W

    # (TH+2)*W rows of bf16 activations for this tile (body + 2 halo rows).
    x = jnp.concatenate([x_ref[0], ha_ref[0], hb_ref[0]], axis=0)

    # conv3x3 == 3 MXU matmuls (one per dh) with K = 3*Cin; the row window
    # [dh*W, dh*W + TH*W) of the flat tile is exactly the dh-shifted slab,
    # so no per-tap reshape/copy is needed. Accumulate in f32.
    acc = jnp.dot(x[0:n_out], w1_ref[0],
                  preferred_element_type=jnp.float32)
    acc = acc + jnp.dot(x[w_cols:w_cols + n_out], w1_ref[1],
                        preferred_element_type=jnp.float32)
    acc = acc + jnp.dot(x[2 * w_cols:2 * w_cols + n_out], w1_ref[2],
                        preferred_element_type=jnp.float32)

    # bias + ReLU in f32, then bf16 for the channel-dense 1x1 conv matmul.
    h = jnp.maximum(acc + b1_ref[...], 0.0).astype(jnp.bfloat16)
    out = jnp.dot(h, w2_ref[...], preferred_element_type=jnp.float32) + b2_ref[...]
    o_ref[0] = out.astype(o_ref.dtype)


def _vmem_budgets():
    """(per-step tile budget, vmem_limit_bytes), chosen from the chip's VMEM."""
    try:
        cap = pltpu.get_tpu_info().vmem_capacity_bytes
    except Exception:
        cap = 64 * 1024 * 1024                      # conservative (v7x-class)
    if cap >= 100 * 1024 * 1024:                    # v5e / v6e: 128 MiB VMEM
        return 16 * 1024 * 1024, 64 * 1024 * 1024
    return 8 * 1024 * 1024, 32 * 1024 * 1024        # v7x-class: 64 MiB VMEM


def _pick_tile_h(B, H, W, Cin, Cmid, Cout, out_itemsize, budget_bytes,
                 min_grid_steps=4):
    """Largest divisor of H whose per-step VMEM footprint fits the budget,
    preferring tiles that still leave >= min_grid_steps grid steps (keeps both
    v7x TensorCores fed and gives the auto-pipeline steps to overlap)."""
    k = 3 * Cin

    def footprint(th):
        rows_out = th * W
        rows_in = (th + 2) * W
        body = 2 * rows_out * k * 2        # bf16 body block, double-buffered
        halo = 2 * 2 * W * k * 2           # two bf16 halo blocks, double-buffered
        xcat = rows_in * k * 2             # in-kernel concat of body + halo (bf16)
        slab = rows_out * k * 2            # ~1 dh-shifted operand copy (others are aligned views)
        acc = rows_out * Cmid * 4          # f32 accumulator
        hbuf = rows_out * Cmid * 2         # bf16 hidden for the 1x1 matmul
        outv = rows_out * Cout * 4 + 2 * rows_out * Cout * out_itemsize
        wts = (3 * k * Cmid + Cmid * Cout) * 2   # single-buffered bf16 weights
        return body + halo + xcat + slab + acc + hbuf + outv + wts

    divisors = [d for d in range(1, H + 1) if H % d == 0]
    fits = [d for d in divisors if footprint(d) <= budget_bytes]
    if not fits:                                    # pathological: smallest tile
        return divisors[0]
    deep = [d for d in fits if B * (H // d) >= min_grid_steps]
    return max(deep) if deep else max(fits)


def mask_head_pallas(x, w1, b1, w2, b2, *, tile_h=None,
                     x_is_nhwc=False, return_nhwc=False):
    """MaskHead forward.  x: (B,Cin,H,W) NCHW (or NHWC if x_is_nhwc=True);
    w1: (Cmid,Cin,3,3); b1: (Cmid,); w2: (Cout,Cmid,1,1); b2: (Cout,).
    Returns (B,Cout,H,W) NCHW (or NHWC if return_nhwc=True)."""
    if x_is_nhwc:
        B, H, W, Cin = x.shape
        x_nhwc = x
    else:
        B, Cin, H, W = x.shape
        x_nhwc = jnp.transpose(x, (0, 2, 3, 1))      # channels on lanes
    Cmid = w1.shape[0]
    Cout = w2.shape[0]
    out_dtype = x.dtype

    # Sublane layout of the tiled blocks needs W % 8 == 0 (true for RAFT's
    # 1/8-resolution feature maps).
    assert W % 8 == 0, "mask_head_pallas requires W to be a multiple of 8"

    tile_budget, vmem_limit = _vmem_budgets()
    if tile_h is None:
        tile_h = _pick_tile_h(B, H, W, Cin, Cmid, Cout,
                              jnp.dtype(out_dtype).itemsize, tile_budget)
    assert H % tile_h == 0, "tile_h must divide H"
    n_th = H // tile_h

    # bf16 once, *before* the 3x dw-im2col, so every later HBM pass (wrapper
    # concat + kernel DMA) moves half the bytes.  Accumulation stays f32.
    x_bf16 = x_nhwc.astype(jnp.bfloat16)
    x_pad = jnp.pad(x_bf16, ((0, 0), (1, 1), (1, 1), (0, 0)))   # "same" 3x3 pad

    # dw-im2col along W: the 3 dw taps become one contiguous 3*Cin channel
    # window -> large-K MXU matmuls with no per-tap slice/copy in the kernel.
    xw = jnp.concatenate([x_pad[:, :, 0:W, :],
                          x_pad[:, :, 1:W + 1, :],
                          x_pad[:, :, 2:W + 2, :]], axis=-1)    # (B, H+2, W, 3*Cin)
    xw = xw.reshape(B, (H + 2) * W, 3 * Cin)   # flat rows; NO halo duplication

    # Weights: matmul-ready, bf16 (MXU-native); biases stay f32.
    w1_k = jnp.transpose(w1, (2, 3, 1, 0)).reshape(3, 3 * Cin, Cmid)
    w1_k = w1_k.astype(jnp.bfloat16)
    w2_k = jnp.transpose(w2[:, :, 0, 0], (1, 0)).astype(jnp.bfloat16)
    b1_k = b1.reshape(1, Cmid).astype(jnp.float32)
    b2_k = b2.reshape(1, Cout).astype(jnp.float32)

    body_rows = tile_h * W
    const = dict(pipeline_mode=pl.Buffered(1))   # never change across the grid

    grid_spec = pltpu.PrefetchScalarGridSpec(
        num_scalar_prefetch=0,
        grid=(B, n_th),
        in_specs=[
            # body: TH rows of W pixels (block-indexed, non-overlapping)
            pl.BlockSpec((1, body_rows, 3 * Cin), lambda b, t: (b, t, 0)),
            # 2-row halo below the body, fetched as two W-row-group blocks
            pl.BlockSpec((1, W, 3 * Cin),
                         lambda b, t: (b, (t + 1) * tile_h, 0)),
            pl.BlockSpec((1, W, 3 * Cin),
                         lambda b, t: (b, (t + 1) * tile_h + 1, 0)),
            pl.BlockSpec((3, 3 * Cin, Cmid), lambda b, t: (0, 0, 0), **const),
            pl.BlockSpec((1, Cmid), lambda b, t: (0, 0), **const),
            pl.BlockSpec((Cmid, Cout), lambda b, t: (0, 0), **const),
            pl.BlockSpec((1, Cout), lambda b, t: (0, 0), **const),
        ],
        out_specs=pl.BlockSpec((1, body_rows, Cout), lambda b, t: (b, t, 0)),
    )

    out_flat = pl.pallas_call(
        _mask_head_kernel,
        out_shape=jax.ShapeDtypeStruct((B, H * W, Cout), out_dtype),
        grid_spec=grid_spec,
        compiler_params=pltpu.CompilerParams(
            dimension_semantics=("parallel", "parallel"),
            vmem_limit_bytes=vmem_limit),
    )(xw, xw, xw, w1_k, b1_k, w2_k, b2_k)

    out_nhwc = out_flat.reshape(B, H, W, Cout)
    if return_nhwc:
        return out_nhwc
    return jnp.transpose(out_nhwc, (0, 3, 1, 2))


def _reference(x_nchw, w1, b1, w2, b2):
    """Pure-JAX NCHW reference matching PyTorch conv semantics."""
    dn = jax.lax.conv_dimension_numbers(x_nchw.shape, w1.shape,
                                        ("NCHW", "OIHW", "NCHW"))
    h = jax.lax.conv_general_dilated(x_nchw, w1, (1, 1), ((1, 1), (1, 1)),
                                     dimension_numbers=dn)
    h = jnp.maximum(h + b1[None, :, None, None], 0.0)
    dn2 = jax.lax.conv_dimension_numbers(h.shape, w2.shape,
                                         ("NCHW", "OIHW", "NCHW"))
    o = jax.lax.conv_general_dilated(h, w2, (1, 1), ((0, 0), (0, 0)),
                                     dimension_numbers=dn2)
    return o + b2[None, :, None, None]


if __name__ == "__main__":
    B, Cin, H, W = 2, 4, 16, 16
    Cmid, Cout = 32, 16

    key = jax.random.PRNGKey(0)
    k1, k2, k3, k4, k5 = jax.random.split(key, 5)

    x = jax.random.normal(k1, (B, Cin, H, W), jnp.float32)
    # Deterministic synthetic parameters (same shapes as the nn.Module).
    w1 = jax.random.normal(k2, (Cmid, Cin, 3, 3), jnp.float32) * 0.1
    b1 = jax.random.normal(k3, (Cmid,), jnp.float32) * 0.1
    w2 = jax.random.normal(k4, (Cout, Cmid, 1, 1), jnp.float32) * 0.1
    b2 = jax.random.normal(k5, (Cout,), jnp.float32) * 0.1

    ref = _reference(x, w1, b1, w2, b2)

    fn = jax.jit(mask_head_pallas,
                 static_argnames=("tile_h", "x_is_nhwc", "return_nhwc"))

    # Auto tiling (grid gets >= 4 parallel steps) and an explicitly finer
    # tiling (exercises the halo-block / multi-step path further).
    out = jax.block_until_ready(fn(x, w1, b1, w2, b2))
    out_tiled = jax.block_until_ready(fn(x, w1, b1, w2, b2, tile_h=4))

    assert out.shape == (B, Cout, H, W)
    assert out_tiled.shape == (B, Cout, H, W)
    # bf16 MXU operands with f32 accumulation -> compare at ~1e-2 tolerance.
    assert jnp.allclose(out, ref, atol=2e-2, rtol=2e-2), \
        float(jnp.max(jnp.abs(out - ref)))
    assert jnp.allclose(out_tiled, ref, atol=2e-2, rtol=2e-2), \
        float(jnp.max(jnp.abs(out_tiled - ref)))

    print("KERNEL_OK")
</pallas_src>

<mosaic_0001>
module attributes {stable_mosaic.version = 11 : i64} {
  func.func @_mask_head_kernel(%arg0: i32, %arg1: i32, %arg2: memref<1x128x12xbf16, #tpu.memory_space<vmem>>, %arg3: memref<1x16x12xbf16, #tpu.memory_space<vmem>>, %arg4: memref<1x16x12xbf16, #tpu.memory_space<vmem>>, %arg5: memref<3x12x32xbf16, #tpu.memory_space<vmem>>, %arg6: memref<1x32xf32, #tpu.memory_space<vmem>>, %arg7: memref<32x16xbf16, #tpu.memory_space<vmem>>, %arg8: memref<1x16xf32, #tpu.memory_space<vmem>>, %arg9: memref<1x128x16xf32, #tpu.memory_space<vmem>>) attributes {dimension_semantics = [#tpu.dimension_semantics<parallel>, #tpu.dimension_semantics<parallel>], iteration_bounds = array<i64: 2, 2>, scalar_prefetch = 0 : i64, scratch_operands = 0 : i64, tpu.core_type = #tpu.core_type<tc>, window_params = [{transform_indices = @transform_0, window_bounds = array<i64: 1, 128, 12>}, {transform_indices = @transform_1, window_bounds = array<i64: 1, 16, 12>}, {transform_indices = @transform_2, window_bounds = array<i64: 1, 16, 12>}, {pipeline_mode = #tpu.pipeline_mode<synchronous>, transform_indices = @transform_3, window_bounds = array<i64: 3, 12, 32>}, {pipeline_mode = #tpu.pipeline_mode<synchronous>, transform_indices = @transform_4, window_bounds = array<i64: 1, 32>}, {pipeline_mode = #tpu.pipeline_mode<synchronous>, transform_indices = @transform_5, window_bounds = array<i64: 32, 16>}, {pipeline_mode = #tpu.pipeline_mode<synchronous>, transform_indices = @transform_6, window_bounds = array<i64: 1, 16>}, {transform_indices = @transform_7, window_bounds = array<i64: 1, 128, 16>}]} {
    %c0 = arith.constant 0 : index
    %c0_0 = arith.constant 0 : index
    %c0_1 = arith.constant 0 : index
    %0 = vector.load %arg2[%c0, %c0_0, %c0_1] : memref<1x128x12xbf16, #tpu.memory_space<vmem>>, vector<1x128x12xbf16>
    %1 = vector.shape_cast %0 : vector<1x128x12xbf16> to vector<128x12xbf16>
    %c0_2 = arith.constant 0 : index
    %c0_3 = arith.constant 0 : index
    %c0_4 = arith.constant 0 : index
    %2 = vector.load %arg3[%c0_2, %c0_3, %c0_4] : memref<1x16x12xbf16, #tpu.memory_space<vmem>>, vector<1x16x12xbf16>
    %3 = vector.shape_cast %2 : vector<1x16x12xbf16> to vector<16x12xbf16>
    %c0_5 = arith.constant 0 : index
    %c0_6 = arith.constant 0 : index
    %c0_7 = arith.constant 0 : index
    %4 = vector.load %arg4[%c0_5, %c0_6, %c0_7] : memref<1x16x12xbf16, #tpu.memory_space<vmem>>, vector<1x16x12xbf16>
    %5 = vector.shape_cast %4 : vector<1x16x12xbf16> to vector<16x12xbf16>
    %6 = tpu.concatenate %1, %3, %5 in 0 : vector<128x12xbf16>, vector<16x12xbf16>, vector<16x12xbf16> -> vector<160x12xbf16>
    %7 = vector.extract_strided_slice %6 {offsets = [0, 0], sizes = [128, 12], strides = [1, 1]} : vector<160x12xbf16> to vector<128x12xbf16>
    %c0_8 = arith.constant 0 : index
    %c0_9 = arith.constant 0 : index
    %c0_10 = arith.constant 0 : index
    %8 = vector.load %arg5[%c0_8, %c0_9, %c0_10] : memref<3x12x32xbf16, #tpu.memory_space<vmem>>, vector<1x12x32xbf16>
    %9 = vector.shape_cast %8 : vector<1x12x32xbf16> to vector<12x32xbf16>
    %cst = arith.constant dense<0.000000e+00> : vector<128x32xf32>
    %10 = tpu.matmul %7, %9, %cst {dimension_numbers = #tpu.dot_dimension_numbers<[1], [0], [0], [1], [0, 0, 1, 1], [], []>} : vector<128x12xbf16>, vector<12x32xbf16>, vector<128x32xf32> -> vector<128x32xf32>
    %11 = vector.extract_strided_slice %6 {offsets = [16, 0], sizes = [128, 12], strides = [1, 1]} : vector<160x12xbf16> to vector<128x12xbf16>
    %c1 = arith.constant 1 : index
    %c0_11 = arith.constant 0 : index
    %c0_12 = arith.constant 0 : index
    %12 = vector.load %arg5[%c1, %c0_11, %c0_12] : memref<3x12x32xbf16, #tpu.memory_space<vmem>>, vector<1x12x32xbf16>
    %13 = vector.shape_cast %12 : vector<1x12x32xbf16> to vector<12x32xbf16>
    %cst_13 = arith.constant dense<0.000000e+00> : vector<128x32xf32>
    %14 = tpu.matmul %11, %13, %cst_13 {dimension_numbers = #tpu.dot_dimension_numbers<[1], [0], [0], [1], [0, 0, 1, 1], [], []>} : vector<128x12xbf16>, vector<12x32xbf16>, vector<128x32xf32> -> vector<128x32xf32>
    %15 = arith.addf %10, %14 : vector<128x32xf32>
    %16 = vector.extract_strided_slice %6 {offsets = [32, 0], sizes = [128, 12], strides = [1, 1]} : vector<160x12xbf16> to vector<128x12xbf16>
    %c2 = arith.constant 2 : index
    %c0_14 = arith.constant 0 : index
    %c0_15 = arith.constant 0 : index
    %17 = vector.load %arg5[%c2, %c0_14, %c0_15] : memref<3x12x32xbf16, #tpu.memory_space<vmem>>, vector<1x12x32xbf16>
    %18 = vector.shape_cast %17 : vector<1x12x32xbf16> to vector<12x32xbf16>
    %cst_16 = arith.constant dense<0.000000e+00> : vector<128x32xf32>
    %19 = tpu.matmul %16, %18, %cst_16 {dimension_numbers = #tpu.dot_dimension_numbers<[1], [0], [0], [1], [0, 0, 1, 1], [], []>} : vector<128x12xbf16>, vector<12x32xbf16>, vector<128x32xf32> -> vector<128x32xf32>
    %20 = arith.addf %15, %19 : vector<128x32xf32>
    %c0_17 = arith.constant 0 : index
    %c0_18 = arith.constant 0 : index
    %21 = vector.load %arg6[%c0_17, %c0_18] : memref<1x32xf32, #tpu.memory_space<vmem>>, vector<1x32xf32>
    %22 = vector.broadcast %21 : vector<1x32xf32> to vector<128x32xf32>
    %23 = arith.addf %20, %22 : vector<128x32xf32>
    %cst_19 = arith.constant 0.000000e+00 : f32
    %24 = vector.broadcast %cst_19 : f32 to vector<128x32xf32>
    %25 = arith.maximumf %23, %24 : vector<128x32xf32>
    %26 = arith.truncf %25 : vector<128x32xf32> to vector<128x32xbf16>
    %c0_20 = arith.constant 0 : index
    %c0_21 = arith.constant 0 : index
    %27 = vector.load %arg7[%c0_20, %c0_21] : memref<32x16xbf16, #tpu.memory_space<vmem>>, vector<32x16xbf16>
    %cst_22 = arith.constant dense<0.000000e+00> : vector<128x16xf32>
    %28 = tpu.matmul %26, %27, %cst_22 {dimension_numbers = #tpu.dot_dimension_numbers<[1], [0], [0], [1], [0, 0, 1, 1], [], []>} : vector<128x32xbf16>, vector<32x16xbf16>, vector<128x16xf32> -> vector<128x16xf32>
    %c0_23 = arith.constant 0 : index
    %c0_24 = arith.constant 0 : index
    %29 = vector.load %arg8[%c0_23, %c0_24] : memref<1x16xf32, #tpu.memory_space<vmem>>, vector<1x16xf32>
    %30 = vector.broadcast %29 : vector<1x16xf32> to vector<128x16xf32>
    %31 = arith.addf %28, %30 : vector<128x16xf32>
    %c0_25 = arith.constant 0 : index
    %c0_26 = arith.constant 0 : index
    %c0_27 = arith.constant 0 : index
    %32 = vector.load %arg9[%c0_25, %c0_26, %c0_27] : memref<1x128x16xf32, #tpu.memory_space<vmem>>, vector<1x128x16xf32>
    %33 = vector.shape_cast %32 : vector<1x128x16xf32> to vector<128x16xf32>
    %34 = vector.shape_cast %31 : vector<128x16xf32> to vector<1x128x16xf32>
    tpu.vector_store %arg9[%c0_25, %c0_26, %c0_27], %34 {strides = array<i32>} : memref<1x128x16xf32, #tpu.memory_space<vmem>>, vector<1x128x16xf32>,
    return
  }
  func.func @transform_0(%arg0: i32, %arg1: i32) -> (i32, i32, i32) {
    %c0_i32 = arith.constant 0 : i32
    %c0_i32_0 = arith.constant 0 : i32
    return %arg0, %arg1, %c0_i32 : i32, i32, i32
  }
  func.func @transform_1(%arg0: i32, %arg1: i32) -> (i32, i32, i32) {
    %c1_i32 = arith.constant 1 : i32
    %0 = arith.addi %arg1, %c1_i32 : i32
    %c8_i32 = arith.constant 8 : i32
    %1 = arith.muli %0, %c8_i32 : i32
    %c0_i32 = arith.constant 0 : i32
    %c0_i32_0 = arith.constant 0 : i32
    return %arg0, %1, %c0_i32 : i32, i32, i32
  }
  func.func @transform_2(%arg0: i32, %arg1: i32) -> (i32, i32, i32) {
    %c1_i32 = arith.constant 1 : i32
    %0 = arith.addi %arg1, %c1_i32 : i32
    %c8_i32 = arith.constant 8 : i32
    %1 = arith.muli %0, %c8_i32 : i32
    %c1_i32_0 = arith.constant 1 : i32
    %2 = arith.addi %1, %c1_i32_0 : i32
    %c0_i32 = arith.constant 0 : i32
    %c0_i32_1 = arith.constant 0 : i32
    return %arg0, %2, %c0_i32 : i32, i32, i32
  }
  func.func @transform_3(%arg0: i32, %arg1: i32) -> (i32, i32, i32) {
    %c0_i32 = arith.constant 0 : i32
    %c0_i32_0 = arith.constant 0 : i32
    %c0_i32_1 = arith.constant 0 : i32
    %c0_i32_2 = arith.constant 0 : i32
    return %c0_i32, %c0_i32_0, %c0_i32_1 : i32, i32, i32
  }
  func.func @transform_4(%arg0: i32, %arg1: i32) -> (i32, i32) {
    %c0_i32 = arith.constant 0 : i32
    %c0_i32_0 = arith.constant 0 : i32
    %c0_i32_1 = arith.constant 0 : i32
    return %c0_i32, %c0_i32_0 : i32, i32
  }
  func.func @transform_5(%arg0: i32, %arg1: i32) -> (i32, i32) {
    %c0_i32 = arith.constant 0 : i32
    %c0_i32_0 = arith.constant 0 : i32
    %c0_i32_1 = arith.constant 0 : i32
    return %c0_i32, %c0_i32_0 : i32, i32
  }
  func.func @transform_6(%arg0: i32, %arg1: i32) -> (i32, i32) {
    %c0_i32 = arith.constant 0 : i32
    %c0_i32_0 = arith.constant 0 : i32
    %c0_i32_1 = arith.constant 0 : i32
    return %c0_i32, %c0_i32_0 : i32, i32
  }
  func.func @transform_7(%arg0: i32, %arg1: i32) -> (i32, i32, i32) {
    %c0_i32 = arith.constant 0 : i32
    %c0_i32_0 = arith.constant 0 : i32
    return %arg0, %arg1, %c0_i32 : i32, i32, i32
  }
}

</mosaic_0001>

<bundles_post_ra>
// kernel: mask_head_pallas.1
= control target key start
LH: loop header
LB: loop body
LE: loop exit
PB: predicated region body
PF: predicated region fallthrough
CT: control target
= control target key end

     0   :  { %s1599_s24 = smov 0   ;;  %s1601_s25 = smov 0   ;;  %s1808_s0 = inlined_call_operand.vmem [shape: bf16[2,288,12], index: 0, kind: input, shape index: {}, may-alias: {0,1,2}]   ;;  %s1809_s1 = inlined_call_operand.vmem [shape: bf16[2,288,12], index: 1, kind: input, shape index: {}, may-alias: {0,1,2}]   ;;  %s1810_s2 = inlined_call_operand.vmem [shape: bf16[2,288,12], index: 2, kind: input, shape index: {}, may-alias: {0,1,2}]   ;;  %s1811_s3 = inlined_call_operand.vmem [shape: bf16[3,12,32], index: 3, kind: input, shape index: {}]   ;;  %s1812_s4 = inlined_call_operand.vmem [shape: f32[1,32], index: 4, kind: input, shape index: {}]   ;;  %s1813_s5 = inlined_call_operand.vmem [shape: bf16[32,16], index: 5, kind: input, shape index: {}]   ;;  %s1814_s6 = inlined_call_operand.vmem [shape: f32[1,16], index: 6, kind: input, shape index: {}]   ;;  %s1815_s7 = inlined_call_operand.vmem [shape: f32[2,256,16], index: 7, kind: output, shape index: {}]  }
   0x1   :  { %s1603_s26 = smov 0   ;;  %s1605_s27 = smov 0  }
   0x2   :  { %s1607_s28 = smov 0  }
   0x3 LB: > { %s26_s29 = sadd.s32 1, %s1549_s26  ;;  %s29_s30 = sadd.s32 1, %s1553_s27  ;;  %s1557_s28 = sphi %s1607_s28, %s17_s28   ;;  %s1553_s27 = sphi %s1605_s27, %s1819_s27   ;;  %s1549_s26 = sphi %s1603_s26, %s1818_s26   ;;  %s1545_s25 = sphi %s1601_s25, %s1817_s25   ;;  %s1541_s24 = sphi %s1599_s24, %s1816_s24  }
   0x4   : > { %p27_p0 = scmp.ge.s32.totalorder %s26_s29, 2  ;;  %p1230_p1 = scmp.ge.s32.totalorder %s1557_s28, 1 }
   0x5   : > { %p320_p2 = scmp.lt.s32.totalorder %s1557_s28, 5 }
   0x6   : > { %s1821_s29 = smov (%p27_p0, %s26_s29), 0  ;;  %s1823_s30 = smov (!%p27_p0, %s29_s30), %s1553_s27 }
   0x7   : > { %p321_p3 = pnand %p1230_p1, %p320_p2  ;;  %p31_p4 = scmp.ge.s32.totalorder %s1823_s30, 2 }
   0x8   : > { %vm551_vm0 = vcmask (!%p321_p3), 1045504   ;;  %s1629_s8 = sshll.u32 (!%p321_p3), %s1541_s24, 4  ;;  %v1504_v0 = vld [vmem:[%s1811_s3] sm:$0x3f] (!%p321_p3)   ;;  %p392_p5 = scmp.lt.s32.totalorder (!%p321_p3), %s1545_s25, 1  ;;  %vm526_vm1 = vcmask (!%p321_p3), 97280  }
   0x9   : > { %s1825_s30 = smov (%p31_p4, %s1823_s30), 0  ;;  %324 = sbr.rel (%p321_p3) target bundleno = 523 (0x20b), region = 48 }
   0xa   : > { %p394_p6 = scmp.lt.s32.totalorder (!%p321_p3), %s1629_s8, 35  ;;  %v1506_v1 = vld [vmem:[%s1811_s3 + $0x10] sm:$0x3f] (!%p321_p3)   ;;  %1461 = vmatprep.subr.msk.bf16.mxu0 (!%p321_p3), %vm551_vm0, %v1504_v0  ;;  %v661_v2 = vsel (!%p321_p3), %vm551_vm0, %v1504_v0, 0  ;;  %v1514_v3 = vld [vmem:[%s1811_s3 + $0x8] sm:$0x3f] (!%p321_p3)  }
   0xb   : > { %1373 = vmatpush3.bf16.msra.mxu0 (!%p321_p3), %v661_v2  ;;  %v1517_v4 = vld [vmem:[%s1813_s5] sm:$0xff] (!%p321_p3)   ;;  %s1313_s19 = sadd.s32 (!%p321_p3), 16, %s1629_s8  ;;  %1460 = vmatprep.subr.msk.bf16.mxu1 (!%p321_p3), %vm551_vm0, %v1514_v3  ;;  %v553_v5 = vsel (!%p321_p3), %vm551_vm0, %v1514_v3, 0  ;;  %v772_v6 = vsel (!%p321_p3), %vm551_vm0, %v1506_v1, 0  ;;  %v1518_v10 = vld [vmem:[%s1813_s5 + $0x8] sm:$0xff] (!%p321_p3)   ;;  %vm957_vm2 = vcmask (!%p321_p3), 261120  }
   0xc   : > { %1462 = vmatprep.subr.msk.bf16.mxu0 (!%p321_p3), %vm551_vm0, %v1506_v1  ;;  %p410_p7 = scmp.lt.s32.totalorder (!%p321_p3), %s1313_s19, 35  ;;  %s1311_s20 = sadd.s32 (!%p321_p3), 2, %s1313_s19  ;;  %1355 = vmatpush3.bf16.msra.mxu1 (!%p321_p3), %v553_v5  ;;  %v1720_v35 = vld [vmem:[%s1812_s4] ss:$0 sm:$0xff] (!%p321_p3)  ;;  %vm1079_vm3 = vcmask (!%p321_p3), 130048  }
   0xd   : > { %p425_p8 = scmp.lt.s32.totalorder (!%p321_p3), %s1311_s20, 35  ;;  %1408 = vmatprep.subr.bf16.mxu1 (!%p321_p3), %v1517_v4  ;;  %p438_p9 = scmp.lt.s32.totalorder (!%p321_p3), %s1629_s8, 31 }
  0x10   : > { %s1827_s25 = smov (!%p392_p5, %s1545_s25), 1  ;;  %s1829_s19 = smov (!%p410_p7, %s1313_s19), 35 }
  0x11   : > { %s395_s13 = scalar_select %p394_p6, %s1629_s8, 35 }
  0x12   : > { %s1650_s18 = smul.u32 36, %s1827_s25  ;;  %s1831_s20 = smov (!%p425_p8, %s1311_s20), 35 }
  0x13   : > { %s1833_s8 = smov (!%p438_p9, %s1629_s8), 31  ;;  %s1240_s24 = sshll.u32 %s1827_s25, 5 }
  0x14   : > { %s397_s21 = sadd.s32 %s1650_s18, %s395_s13  ;;  %s413_s10 = sadd.s32 %s1650_s18, %s1829_s19 }
  0x15   : > { %s1232_s22 = sshll.u32 %s397_s21, 2  ;;  %s428_s11 = sadd.s32 %s1650_s18, %s1831_s20 }
  0x16   : > { %s1660_s9 = scalar_lea.vmem %s1808_s0, %s1232_s22  ;;  %s1235_s14 = sshll.u32 %s413_s10, 2 }
  0x17   : > { %v1505_v7 = vld [vmem:[%s1660_s9] sm:$0xff]   ;;  %v1507_v8 = vld [vmem:[%s1660_s9 + $0x8] sm:$0xff]   ;;  %v1508_v9 = vld [vmem:[%s1660_s9 + $0x10] sm:$0xff]   ;;  %s1677_s15 = sshll.u32 %s428_s11, 2  ;;  %s415_s18 = scalar_lea.vmem %s1809_s1, %s1235_s14 }
  0x18   : > { %1374 = vmatprep.mubr.msk.bf16.mxu0 %vm526_vm1, %v1505_v7  ;;  %1356 = vmatprep.mubr.msk.bf16.mxu1 %vm526_vm1, %v1507_v8  ;;  %v1509_v11 = vld [vmem:[%s1660_s9 + $0x18] sm:$0xff]   ;;  %v1510_v12 = vld [vmem:[%s1660_s9 + $0x20] sm:$0xff]   ;;  %s430_s21 = scalar_lea.vmem %s1810_s2, %s1677_s15  ;;  %v1511_v13 = vld [vmem:[%s1660_s9 + $0x28] sm:$0xff]  }
  0x19   : > { %1375 = vmatmul.mubr.msk.bf16.vlgmr.msra.gmra.mrb[0].mxu0 %vm526_vm1, %v1507_v8  ;;  %1357 = vmatmul.mubr.msk.bf16.vlgmr.msra.gmra.mrb[0].mxu1 %vm526_vm1, %v1508_v9  ;;  %v1512_v14 = vld [vmem:[%s1660_s9 + $0x30] sm:$0xff]   ;;  %v1513_v15 = vld [vmem:[%s1660_s9 + $0x38] sm:$0xff]   ;;  %v1515_v16 = vld [vmem:[%s415_s18] sm:$0xff]   ;;  %s441_s9 = sadd.s32 %s1240_s24, %s1833_s8 }
  0x1a   : > { %1391 = vmatpush3.bf16.msra.mxu0 %v772_v6  ;;  %1378 = vmatprep.mubr.msk.bf16.mxu0 %vm526_vm1, %v1508_v9  ;;  %v1516_v17 = vld [vmem:[%s430_s21] sm:$0xff]   ;;  %s1241_s10 = sshll.u32 %s441_s9, 3 }
  0x1b   : > { %1360 = vmatprep.mubr.msk.bf16.mxu1 %vm526_vm1, %v1509_v11  ;;  %1409 = vmatpush3.bf16.msra.mxu1 %v1517_v4  ;;  %s1759_s15 = scalar_lea.vmem %s1815_s7, %s1241_s10 }
  0x1c   : > { %1410 = vmatprep.subr.bf16.mxu1 %v1518_v10 }
  0x1f   : > { %1411 = vmatpush3.bf16.msra.mxu1 %v1518_v10 }
  0x21   : > { %1379 = vmatmul.mubr.msk.bf16.gmra.mrb[4].mxu0 %vm526_vm1, %v1509_v11  ;;  %1361 = vmatmul.mubr.msk.bf16.gmra.mrb[4].mxu1 %vm526_vm1, %v1510_v12 }
  0x22   : > { %1382 = vmatprep.mubr.msk.bf16.mxu0 %vm526_vm1, %v1510_v12  ;;  %1364 = vmatprep.mubr.msk.bf16.mxu1 %vm526_vm1, %v1511_v13 }
  0x29   : > { %1383 = vmatmul.mubr.msk.bf16.gmra.mrb[8].mxu0 %vm526_vm1, %v1511_v13  ;;  %1365 = vmatmul.mubr.msk.bf16.gmra.mrb[8].mxu1 %vm526_vm1, %v1512_v14 }
  0x2a   : > { %1386 = vmatprep.mubr.msk.bf16.mxu0 %vm526_vm1, %v1512_v14  ;;  %1368 = vmatprep.mubr.msk.bf16.mxu1 %vm526_vm1, %v1513_v15 }
  0x31   : > { %1387 = vmatmul.mubr.msk.bf16.gmra.mrb[12].mxu0 %vm526_vm1, %v1513_v15  ;;  %1369 = vmatmul.mubr.msk.bf16.gmra.mrb[12].mxu1 %vm526_vm1, %v1515_v16 }
  0x32   : > { %1392 = vmatprep.mubr.msk.bf16.mxu0 %vm526_vm1, %v1508_v9 }
  0x39   : > { %1393 = vmatmul.mubr.msk.bf16.vlgmr.msra.gmra.mrb[0].mxu0 %vm526_vm1, %v1509_v11 }
  0x3a   : > { %1396 = vmatprep.mubr.msk.bf16.mxu0 %vm526_vm1, %v1510_v12 }
  0x41   : > { %1397 = vmatmul.mubr.msk.bf16.gmra.mrb[4].mxu0 %vm526_vm1, %v1511_v13 }
  0x42   : > { %1400 = vmatprep.mubr.msk.bf16.mxu0 %vm526_vm1, %v1512_v14 }
  0x49   : > { %1401 = vmatmul.mubr.msk.bf16.gmra.mrb[8].mxu0 %vm526_vm1, %v1513_v15 }
  0x4a   : > { %1404 = vmatprep.mubr.msk.bf16.mxu0 %vm526_vm1, %v1515_v16 }
  0x51   : > { %1405 = vmatmul.mubr.msk.bf16.gmra.mrb[12].mxu0 %vm526_vm1, %v1516_v17 }
  0xec   : > { %v1358_v18 = vpop.f32.mrb[0].mxu1 }
  0xed   : > { %v589_v19 = vpop.f32.mrb[1].mxu1 }
  0xee   : > { %v1359_v20 = vpop.f32.mrb[2].mxu1 }
  0xef   : > { %v592_v21 = vpop.f32.mrb[3].mxu1 }
  0xf4   : > { %v1362_v22 = vpop.f32.mrb[4].mxu1 }
  0xf5   : > { %v605_v23 = vpop.f32.mrb[5].mxu1 }
  0xf6   : > { %v1363_v24 = vpop.f32.mrb[6].mxu1 }
  0xf7   : > { %v608_v25 = vpop.f32.mrb[7].mxu1 }
  0xfc   : > { %v1366_v26 = vpop.f32.mrb[8].mxu1 }
  0xfd   : > { %v621_v27 = vpop.f32.mrb[9].mxu1 }
  0xfe   : > { %v1367_v28 = vpop.f32.mrb[10].mxu1 }
  0xff   : > { %v624_v29 = vpop.f32.mrb[11].mxu1 }
 0x104   : > { %v1709_v30 = vpop.f32.mrb[12].mxu1 }
 0x105   : > { %v1711_v31 = vpop.f32.mrb[13].mxu1 }
 0x106   : > { %v1713_v32 = vpop.f32.mrb[14].mxu1 }
 0x107   : > { %v1715_v33 = vpop.f32.mrb[15].mxu1 }
 0x10c   : > { %v1394_v34 = vpop.f32.mrb[0].mxu0 }
 0x10d   : > { %v1428_v36 = vadd.f32 %v1394_v34, %v1358_v18  ;;  %v808_v37 = vpop.f32.mrb[1].mxu0 }
 0x10e   : > { %v1429_v38 = vadd.f32 %v808_v37, %v589_v19  ;;  %v1395_v39 = vpop.f32.mrb[2].mxu0 }
 0x10f   : > { %v896_v40 = vadd.f32 %v1428_v36, %v1720_v35  ;;  %v1430_v41 = vadd.f32 %v1395_v39, %v1359_v20  ;;  %v811_v42 = vpop.f32.mrb[3].mxu0 }
 0x110   : > { %v894_v43 = vadd.f32 %v1429_v38, %v1720_v35  ;;  %v1431_v44 = vadd.f32 %v811_v42, %v592_v21 }
 0x111   : > { %v897_v45 = vadd.f32 %v1430_v41, %v1720_v35  ;;  %v912_v47 = vmax.f32 %v896_v40, 0.0 }
 0x112   : > { %v895_v46 = vadd.f32 %v1431_v44, %v1720_v35  ;;  %v910_v49 = vmax.f32 %v894_v43, 0.0 }
 0x113   : > { %v913_v48 = vmax.f32 %v897_v45, 0.0 }
 0x114   : > { %v911_v50 = vmax.f32 %v895_v46, 0.0  ;;  %v1398_v51 = vpop.f32.mrb[4].mxu0 }
 0x115   : > { %v927_v52 = vpack.c.bf16 %v913_v48, %v912_v47  ;;  %v1432_v53 = vadd.f32 %v1398_v51, %v1362_v22  ;;  %v824_v54 = vpop.f32.mrb[5].mxu0 }
 0x116   : > { %v926_v55 = vpack.c.bf16 %v911_v50, %v910_v49  ;;  %v1433_v56 = vadd.f32 %v824_v54, %v605_v23  ;;  %v1399_v57 = vpop.f32.mrb[6].mxu0 }
 0x117   : > { %v900_v58 = vadd.f32 %v1432_v53, %v1720_v35  ;;  %v1434_v59 = vadd.f32 %v1399_v57, %v1363_v24  ;;  %v827_v60 = vpop.f32.mrb[7].mxu0 }
 0x118   : > { %v898_v61 = vadd.f32 %v1433_v56, %v1720_v35  ;;  %v1435_v62 = vadd.f32 %v827_v60, %v608_v25  ;;  %1412 = vmatprep.mubr.msk.bf16.mxu1 %vm957_vm2, %v926_v55 }
 0x119   : > { %v901_v63 = vadd.f32 %v1434_v59, %v1720_v35  ;;  %1413 = vmatmul.mubr.msk.bf16.vlgmr.msra.gmra.mrb[16].mxu1 %vm957_vm2, %v927_v52  ;;  %v916_v1 = vmax.f32 %v900_v58, 0.0 }
 0x11a   : > { %v899_v0 = vadd.f32 %v1435_v62, %v1720_v35  ;;  %v914_v3 = vmax.f32 %v898_v61, 0.0 }
 0x11b   : > { %v917_v2 = vmax.f32 %v901_v63, 0.0 }
 0x11c   : > { %v915_v4 = vmax.f32 %v899_v0, 0.0  ;;  %v1402_v5 = vpop.f32.mrb[8].mxu0 }
 0x11d   : > { %v929_v6 = vpack.c.bf16 %v917_v2, %v916_v1  ;;  %v1436_v7 = vadd.f32 %v1402_v5, %v1366_v26  ;;  %v840_v8 = vpop.f32.mrb[9].mxu0 }
 0x11e   : > { %v928_v9 = vpack.c.bf16 %v915_v4, %v914_v3  ;;  %v1437_v10 = vadd.f32 %v840_v8, %v621_v27  ;;  %v1403_v11 = vpop.f32.mrb[10].mxu0 }
 0x11f   : > { %v904_v12 = vadd.f32 %v1436_v7, %v1720_v35  ;;  %v1438_v13 = vadd.f32 %v1403_v11, %v1367_v28  ;;  %v843_v14 = vpop.f32.mrb[11].mxu0 }
 0x120   : > { %v902_v15 = vadd.f32 %v1437_v10, %v1720_v35  ;;  %v1439_v16 = vadd.f32 %v843_v14, %v624_v29  ;;  %1416 = vmatprep.mubr.msk.bf16.mxu1 %vm957_vm2, %v928_v9 }
 0x121   : > { %v905_v17 = vadd.f32 %v1438_v13, %v1720_v35  ;;  %1417 = vmatmul.mubr.msk.bf16.gmra.mrb[20].mxu1 %vm957_vm2, %v929_v6  ;;  %v920_v19 = vmax.f32 %v904_v12, 0.0 }
 0x122   : > { %v903_v18 = vadd.f32 %v1439_v16, %v1720_v35  ;;  %v918_v21 = vmax.f32 %v902_v15, 0.0 }
 0x123   : > { %v921_v20 = vmax.f32 %v905_v17, 0.0 }
 0x124   : > { %v919_v22 = vmax.f32 %v903_v18, 0.0  ;;  %v1406_v23 = vpop.f32.mrb[12].mxu0 }
 0x125   : > { %v931_v24 = vpack.c.bf16 %v921_v20, %v920_v19  ;;  %v1440_v25 = vadd.f32 %v1406_v23, %v1709_v30  ;;  %v856_v26 = vpop.f32.mrb[13].mxu0 }
 0x126   : > { %v930_v27 = vpack.c.bf16 %v919_v22, %v918_v21  ;;  %v1441_v28 = vadd.f32 %v856_v26, %v1711_v31  ;;  %v1407_v29 = vpop.f32.mrb[14].mxu0 }
 0x127   : > { %v908_v34 = vadd.f32 %v1440_v25, %v1720_v35  ;;  %v1442_v36 = vadd.f32 %v1407_v29, %v1713_v32  ;;  %v859_v37 = vpop.f32.mrb[15].mxu0 }
 0x128   : > { %v906_v38 = vadd.f32 %v1441_v28, %v1720_v35  ;;  %v1443_v39 = vadd.f32 %v859_v37, %v1715_v33  ;;  %1420 = vmatprep.mubr.msk.bf16.mxu1 %vm957_vm2, %v930_v27  ;;  %v1284_v33 = vld [vmem:[%s1814_s6] ss:$0 sm:$0xff] }
 0x129   : > { %v909_v30 = vadd.f32 %v1442_v36, %v1720_v35  ;;  %1421 = vmatmul.mubr.msk.bf16.gmra.mrb[24].mxu1 %vm957_vm2, %v931_v24  ;;  %v924_v40 = vmax.f32 %v908_v34, 0.0 }
 0x12a   : > { %v907_v31 = vadd.f32 %v1443_v39, %v1720_v35  ;;  %v922_v42 = vmax.f32 %v906_v38, 0.0 }
 0x12b   : > { %v925_v41 = vmax.f32 %v909_v30, 0.0 }
 0x12c   : > { %v923_v32 = vmax.f32 %v907_v31, 0.0 }
 0x12d   : > { %v933_v43 = vpack.c.bf16 %v925_v41, %v924_v40 }
 0x12e   : > { %v932_v44 = vpack.c.bf16 %v923_v32, %v922_v42 }
 0x130   : > { %1424 = vmatprep.mubr.msk.bf16.mxu1 %vm957_vm2, %v932_v44 }
 0x131   : > { %1425 = vmatmul.mubr.msk.bf16.gmra.mrb[28].mxu1 %vm957_vm2, %v933_v43 }
 0x1ec   : > { %v1414_v35 = vpop.f32.mrb[16].mxu1 }
 0x1ed   : > { %v1025_v45 = vadd.f32 %v1414_v35, %v1284_v33  ;;  %v1016_v46 = vpop.f32.mrb[17].mxu1 }
 0x1ee   : > { %v1017_v47 = vadd.f32 %v1284_v33, %v1016_v46  ;;  %v1415_v48 = vpop.f32.mrb[18].mxu1 }
 0x1ef   : > { %1082 = vst.msk [vmem:[%s1759_s15 + $0x10] sm:$0xff] %vm1079_vm3, %v1025_v45  ;;  %v1028_v49 = vadd.f32 %v1415_v48, %v1284_v33  ;;  %v1019_v50 = vpop.f32.mrb[19].mxu1 }
 0x1f0   : > { %1080 = vst.msk [vmem:[%s1759_s15] sm:$0xff] %vm1079_vm3, %v1017_v47  ;;  %v1020_v51 = vadd.f32 %v1284_v33, %v1019_v50 }
 0x1f1   : > { %1083 = vst.msk [vmem:[%s1759_s15 + $0x18] sm:$0xff] %vm1079_vm3, %v1028_v49 }
 0x1f2   : > { %1081 = vst.msk [vmem:[%s1759_s15 + $0x8] sm:$0xff] %vm1079_vm3, %v1020_v51 }
 0x1f4   : > { %v1418_v52 = vpop.f32.mrb[20].mxu1 }
 0x1f5   : > { %v1041_v53 = vadd.f32 %v1418_v52, %v1284_v33  ;;  %v1032_v54 = vpop.f32.mrb[21].mxu1 }
 0x1f6   : > { %v1033_v55 = vadd.f32 %v1284_v33, %v1032_v54  ;;  %v1419_v56 = vpop.f32.mrb[22].mxu1 }
 0x1f7   : > { %1086 = vst.msk [vmem:[%s1759_s15 + $0x30] sm:$0xff] %vm1079_vm3, %v1041_v53  ;;  %v1044_v57 = vadd.f32 %v1419_v56, %v1284_v33  ;;  %v1035_v58 = vpop.f32.mrb[23].mxu1 }
 0x1f8   : > { %1084 = vst.msk [vmem:[%s1759_s15 + $0x20] sm:$0xff] %vm1079_vm3, %v1033_v55  ;;  %v1036_v59 = vadd.f32 %v1284_v33, %v1035_v58 }
 0x1f9   : > { %1087 = vst.msk [vmem:[%s1759_s15 + $0x38] sm:$0xff] %vm1079_vm3, %v1044_v57 }
 0x1fa   : > { %1085 = vst.msk [vmem:[%s1759_s15 + $0x28] sm:$0xff] %vm1079_vm3, %v1036_v59 }
 0x1fc   : > { %v1422_v60 = vpop.f32.mrb[24].mxu1 }
 0x1fd   : > { %v1057_v61 = vadd.f32 %v1422_v60, %v1284_v33  ;;  %v1048_v62 = vpop.f32.mrb[25].mxu1 }
 0x1fe   : > { %v1049_v63 = vadd.f32 %v1284_v33, %v1048_v62  ;;  %v1423_v0 = vpop.f32.mrb[26].mxu1 }
 0x1ff   : > { %1090 = vst.msk [vmem:[%s1759_s15 + $0x50] sm:$0xff] %vm1079_vm3, %v1057_v61  ;;  %v1060_v1 = vadd.f32 %v1423_v0, %v1284_v33  ;;  %v1051_v2 = vpop.f32.mrb[27].mxu1 }
 0x200   : > { %1088 = vst.msk [vmem:[%s1759_s15 + $0x40] sm:$0xff] %vm1079_vm3, %v1049_v63  ;;  %v1052_v3 = vadd.f32 %v1284_v33, %v1051_v2 }
 0x201   : > { %1091 = vst.msk [vmem:[%s1759_s15 + $0x58] sm:$0xff] %vm1079_vm3, %v1060_v1 }
 0x202   : > { %1089 = vst.msk [vmem:[%s1759_s15 + $0x48] sm:$0xff] %vm1079_vm3, %v1052_v3 }
 0x204   : > { %v1426_v4 = vpop.f32.mrb[28].mxu1 }
 0x205   : > { %v1073_v5 = vadd.f32 %v1426_v4, %v1284_v33  ;;  %v1064_v6 = vpop.f32.mrb[29].mxu1 }
 0x206   : > { %v1065_v7 = vadd.f32 %v1284_v33, %v1064_v6  ;;  %v1427_v8 = vpop.f32.mrb[30].mxu1 }
 0x207   : > { %1094 = vst.msk [vmem:[%s1759_s15 + $0x70] sm:$0xff] %vm1079_vm3, %v1073_v5  ;;  %v1076_v9 = vadd.f32 %v1427_v8, %v1284_v33  ;;  %v1067_v10 = vpop.f32.mrb[31].mxu1 }
 0x208   : > { %1092 = vst.msk [vmem:[%s1759_s15 + $0x60] sm:$0xff] %vm1079_vm3, %v1065_v7  ;;  %v1068_v11 = vadd.f32 %v1284_v33, %v1067_v10 }
 0x209   : > { %1095 = vst.msk [vmem:[%s1759_s15 + $0x78] sm:$0xff] %vm1079_vm3, %v1076_v9 }
 0x20a   : > { %1093 = vst.msk [vmem:[%s1759_s15 + $0x68] sm:$0xff] %vm1079_vm3, %v1068_v11 }
 0x20b PF: > { %s17_s28 = sadd.s32 1, %s1557_s28   ;;  %s1816_s24 = smov %s1549_s26 }
 0x20c   : > { %p14_p10 = scmp.ge.s32.totalorder %s17_s28, 6   ;;  %s1817_s25 = smov %s1553_s27 }
 0x20d   : > { %s1818_s26 = smov %s1821_s29  ;;  %s1819_s27 = smov %s1825_s30 }
 0x20e   :  { %16 = sbr.rel (!%p14_p10) target bundleno = 3 (0x3), region = 86 }

</bundles_post_ra>
